<compile_context>
chip_gen: v7x
topology: tpu7x:2x2x1
jax: 0.10.0
libtpu: 0.0.40
codegen_flags: <defaults>
</compile_context>

<pallas_src>
import functools

import jax
import jax.numpy as jnp
from jax.experimental import pallas as pl
from jax.experimental.pallas import tpu as pltpu


def _mlp_kernel(num_layers, bf16_epilogue, *refs):
    # refs = (x_ref, w0, b0, w1, b1, ..., w_{L-1}, b_{L-1}, out_ref)
    x_ref = refs[0]
    out_ref = refs[-1]
    param_refs = refs[1:-1]

    ew = jnp.bfloat16 if bf16_epilogue else jnp.float32

    h = x_ref[...]                                        # bf16 [d_in, tile_n]
    for l in range(num_layers):
        w = param_refs[2 * l][...]                        # bf16 [d_out_l, d_in_l]
        b = param_refs[2 * l + 1][...]                    # ew   [d_out_l, 1]
        acc = jnp.dot(w, h, preferred_element_type=jnp.float32)   # MXU, f32 acc
        acc = acc.astype(ew) + b                          # lane-dense epilogue
        if l != num_layers - 1:
            h = jnp.maximum(acc, 0).astype(jnp.bfloat16)  # ReLU; bf16 MXU operand
        else:
            out_ref[...] = acc.astype(out_ref.dtype)      # lane-dense store


def _vpu_has_bf16():
    """bf16 VALU exists on v6e / v7x; keep f32 epilogue on v5e and older."""
    try:
        kind = jax.devices()[0].device_kind.lower()
    except Exception:
        return False
    return any(tag in kind for tag in ("v6", "v7", "7x"))


def _pick_tile_n(n):
    """Multiple of 512 in [512, 4096]; >= ~8 grid steps once N is large."""
    cand = (n // 8) // 512 * 512
    return max(512, min(4096, cand))


def _resident_spec(shape):
    """Whole weight/bias stays VMEM-resident; constant index_map + single buffer."""
    return pl.BlockSpec(shape, lambda i: (0,) * len(shape),
                        pipeline_mode=pl.Buffered(1))


def mlp_forward(x, weights, biases, *, tile_n=None, out_dtype=None):
    """Fused MLP forward.

    x:          [N, dim_in]          (row-major, matching the torch module)
    weights[l]: [d_out_l, d_in_l]    (torch nn.Linear.weight layout)
    biases[l]:  [d_out_l]
    returns     [N, dim_out] in out_dtype (default: x.dtype)
    """
    num_layers = len(weights)
    n, dim_in = x.shape
    dim_out = weights[-1].shape[0]
    if out_dtype is None:
        out_dtype = x.dtype
    if tile_n is None:
        tile_n = _pick_tile_n(n)

    grid = (pl.cdiv(n, tile_n),)
    bf16_epi = _vpu_has_bf16()
    ew_dtype = jnp.bfloat16 if bf16_epi else jnp.float32

    # Samples onto the lane axis; bf16 halves HBM traffic for x.  Single
    # fused transpose+convert pass under jit; no explicit padding (the grid
    # handles the ragged last block, junk columns never reach the output).
    x_t = jnp.transpose(x).astype(jnp.bfloat16)           # [dim_in, N]

    in_specs = [pl.BlockSpec((dim_in, tile_n), lambda i: (0, i))]
    params = []
    for w, b in zip(weights, biases):
        d_o, d_i = w.shape
        in_specs.append(_resident_spec((d_o, d_i)))
        in_specs.append(_resident_spec((d_o, 1)))
        params.append(w.astype(jnp.bfloat16))
        params.append(b.reshape(d_o, 1).astype(ew_dtype))

    out_spec = pl.BlockSpec((dim_out, tile_n), lambda i: (0, i))

    # Advisory cost so XLA schedules the wrapper transpose/convert sensibly.
    flops = 2 * n * sum(int(w.shape[0]) * int(w.shape[1]) for w in weights)
    bytes_accessed = (
        n * dim_in * 2                                   # x^T in (bf16)
        + n * dim_out * jnp.dtype(out_dtype).itemsize    # out
        + sum(int(w.size) * 2 for w in weights)
        + sum(int(b.size) * jnp.dtype(ew_dtype).itemsize for b in biases)
    )
    cost = pl.CostEstimate(flops=flops, transcendentals=0,
                           bytes_accessed=bytes_accessed)

    # VMEM guard only matters for very large tiles; tiny buffers otherwise.
    vmem_limit = 64 * 1024 * 1024 if tile_n >= 4096 else None

    kernel = functools.partial(_mlp_kernel, num_layers, bf16_epi)

    out_t = pl.pallas_call(
        kernel,
        out_shape=jax.ShapeDtypeStruct((dim_out, n), out_dtype),
        grid_spec=pltpu.PrefetchScalarGridSpec(
            num_scalar_prefetch=0,
            grid=grid,
            in_specs=in_specs,
            out_specs=out_spec,
        ),
        compiler_params=pltpu.CompilerParams(
            dimension_semantics=("parallel",),   # shard N tiles across TCs (v7x)
            vmem_limit_bytes=vmem_limit,
        ),
        cost_estimate=cost,
    )(x_t, *params)

    return jnp.transpose(out_t)                           # [N, dim_out]


def init_mlp_params(key, dim_in, dim_out, dim_hidden, num_layers, bias=True):
    """Deterministic init matching nn.Linear shapes (weight: [d_out, d_in])."""
    weights, biases = [], []
    for l in range(num_layers):
        d_i = dim_in if l == 0 else dim_hidden
        d_o = dim_out if l == num_layers - 1 else dim_hidden
        key, kw, kb = jax.random.split(key, 3)
        bound = 1.0 / jnp.sqrt(d_i)
        w = jax.random.uniform(kw, (d_o, d_i), jnp.float32, -bound, bound)
        b = (jax.random.uniform(kb, (d_o,), jnp.float32, -bound, bound)
             if bias else jnp.zeros((d_o,), jnp.float32))
        weights.append(w)
        biases.append(b)
    return weights, biases


def mlp_reference(x, weights, biases):
    h = x
    for l, (w, b) in enumerate(zip(weights, biases)):
        h = h @ w.T + b                      # == F.linear(h, w, b)
        if l != len(weights) - 1:
            h = jnp.maximum(h, 0.0)
    return h


if __name__ == "__main__":
    dim_in, dim_out, dim_hidden, num_layers = 4, 3, 32, 3
    n = 2048                                 # 4 grid steps at adaptive tile_n=512

    key = jax.random.PRNGKey(0)
    key, kx = jax.random.split(key)
    x = jax.random.normal(kx, (n, dim_in), jnp.float32)

    weights, biases = init_mlp_params(key, dim_in, dim_out, dim_hidden, num_layers)

    fwd = jax.jit(mlp_forward)               # fuses transpose+cast around the kernel
    out = jax.block_until_ready(fwd(x, weights, biases))

    ref = mlp_reference(x, weights, biases)
    assert out.shape == (n, dim_out)
    assert out.dtype == x.dtype
    # bf16 MXU operands (and bf16 epilogue on v6e/v7x) -> loosened tolerance.
    assert jnp.allclose(out, ref, atol=5e-2, rtol=5e-2), "mismatch vs reference"

    print("KERNEL_OK")
</pallas_src>

<mosaic_0001>
module attributes {stable_mosaic.version = 11 : i64} {
  func.func @_mlp_kernel(%arg0: i32, %arg1: memref<4x512xbf16, #tpu.memory_space<vmem>>, %arg2: memref<32x4xbf16, #tpu.memory_space<vmem>>, %arg3: memref<32x1xf32, #tpu.memory_space<vmem>>, %arg4: memref<32x32xbf16, #tpu.memory_space<vmem>>, %arg5: memref<32x1xf32, #tpu.memory_space<vmem>>, %arg6: memref<3x32xbf16, #tpu.memory_space<vmem>>, %arg7: memref<3x1xf32, #tpu.memory_space<vmem>>, %arg8: memref<3x512xf32, #tpu.memory_space<vmem>>) attributes {dimension_semantics = [#tpu.dimension_semantics<parallel>], iteration_bounds = array<i64: 4>, scalar_prefetch = 0 : i64, scratch_operands = 0 : i64, tpu.core_type = #tpu.core_type<tc>, window_params = [{transform_indices = @transform_0, window_bounds = array<i64: 4, 512>}, {pipeline_mode = #tpu.pipeline_mode<synchronous>, transform_indices = @transform_1, window_bounds = array<i64: 32, 4>}, {pipeline_mode = #tpu.pipeline_mode<synchronous>, transform_indices = @transform_2, window_bounds = array<i64: 32, 1>}, {pipeline_mode = #tpu.pipeline_mode<synchronous>, transform_indices = @transform_3, window_bounds = array<i64: 32, 32>}, {pipeline_mode = #tpu.pipeline_mode<synchronous>, transform_indices = @transform_4, window_bounds = array<i64: 32, 1>}, {pipeline_mode = #tpu.pipeline_mode<synchronous>, transform_indices = @transform_5, window_bounds = array<i64: 3, 32>}, {pipeline_mode = #tpu.pipeline_mode<synchronous>, transform_indices = @transform_6, window_bounds = array<i64: 3, 1>}, {transform_indices = @transform_7, window_bounds = array<i64: 3, 512>}]} {
    %c0 = arith.constant 0 : index
    %c0_0 = arith.constant 0 : index
    %0 = vector.load %arg1[%c0, %c0_0] : memref<4x512xbf16, #tpu.memory_space<vmem>>, vector<4x512xbf16>
    %c0_1 = arith.constant 0 : index
    %c0_2 = arith.constant 0 : index
    %1 = vector.load %arg2[%c0_1, %c0_2] : memref<32x4xbf16, #tpu.memory_space<vmem>>, vector<32x4xbf16>
    %c0_3 = arith.constant 0 : index
    %c0_4 = arith.constant 0 : index
    %2 = vector.load %arg3[%c0_3, %c0_4] : memref<32x1xf32, #tpu.memory_space<vmem>>, vector<32x1xf32>
    %cst = arith.constant dense<0.000000e+00> : vector<32x512xf32>
    %3 = tpu.matmul %1, %0, %cst {dimension_numbers = #tpu.dot_dimension_numbers<[1], [0], [0], [1], [0, 0, 1, 1], [], []>} : vector<32x4xbf16>, vector<4x512xbf16>, vector<32x512xf32> -> vector<32x512xf32>
    %4 = vector.broadcast %2 : vector<32x1xf32> to vector<32x512xf32>
    %5 = arith.addf %3, %4 : vector<32x512xf32>
    %cst_5 = arith.constant 0.000000e+00 : f32
    %6 = vector.broadcast %cst_5 : f32 to vector<32x512xf32>
    %7 = arith.maximumf %5, %6 : vector<32x512xf32>
    %8 = arith.truncf %7 : vector<32x512xf32> to vector<32x512xbf16>
    %c0_6 = arith.constant 0 : index
    %c0_7 = arith.constant 0 : index
    %9 = vector.load %arg4[%c0_6, %c0_7] : memref<32x32xbf16, #tpu.memory_space<vmem>>, vector<32x32xbf16>
    %c0_8 = arith.constant 0 : index
    %c0_9 = arith.constant 0 : index
    %10 = vector.load %arg5[%c0_8, %c0_9] : memref<32x1xf32, #tpu.memory_space<vmem>>, vector<32x1xf32>
    %cst_10 = arith.constant dense<0.000000e+00> : vector<32x512xf32>
    %11 = tpu.matmul %9, %8, %cst_10 {dimension_numbers = #tpu.dot_dimension_numbers<[1], [0], [0], [1], [0, 0, 1, 1], [], []>} : vector<32x32xbf16>, vector<32x512xbf16>, vector<32x512xf32> -> vector<32x512xf32>
    %12 = vector.broadcast %10 : vector<32x1xf32> to vector<32x512xf32>
    %13 = arith.addf %11, %12 : vector<32x512xf32>
    %cst_11 = arith.constant 0.000000e+00 : f32
    %14 = vector.broadcast %cst_11 : f32 to vector<32x512xf32>
    %15 = arith.maximumf %13, %14 : vector<32x512xf32>
    %16 = arith.truncf %15 : vector<32x512xf32> to vector<32x512xbf16>
    %c0_12 = arith.constant 0 : index
    %c0_13 = arith.constant 0 : index
    %17 = vector.load %arg6[%c0_12, %c0_13] : memref<3x32xbf16, #tpu.memory_space<vmem>>, vector<3x32xbf16>
    %c0_14 = arith.constant 0 : index
    %c0_15 = arith.constant 0 : index
    %18 = vector.load %arg7[%c0_14, %c0_15] : memref<3x1xf32, #tpu.memory_space<vmem>>, vector<3x1xf32>
    %cst_16 = arith.constant dense<0.000000e+00> : vector<3x512xf32>
    %19 = tpu.matmul %17, %16, %cst_16 {dimension_numbers = #tpu.dot_dimension_numbers<[1], [0], [0], [1], [0, 0, 1, 1], [], []>} : vector<3x32xbf16>, vector<32x512xbf16>, vector<3x512xf32> -> vector<3x512xf32>
    %20 = vector.broadcast %18 : vector<3x1xf32> to vector<3x512xf32>
    %21 = arith.addf %19, %20 : vector<3x512xf32>
    %c0_17 = arith.constant 0 : index
    %c0_18 = arith.constant 0 : index
    %22 = vector.load %arg8[%c0_17, %c0_18] : memref<3x512xf32, #tpu.memory_space<vmem>>, vector<3x512xf32>
    tpu.vector_store %arg8[%c0_17, %c0_18], %21 {strides = array<i32>} : memref<3x512xf32, #tpu.memory_space<vmem>>, vector<3x512xf32>,
    return
  }
  func.func @transform_0(%arg0: i32) -> (i32, i32) {
    %c0_i32 = arith.constant 0 : i32
    %c0_i32_0 = arith.constant 0 : i32
    return %c0_i32, %arg0 : i32, i32
  }
  func.func @transform_1(%arg0: i32) -> (i32, i32) {
    %c0_i32 = arith.constant 0 : i32
    %c0_i32_0 = arith.constant 0 : i32
    %c0_i32_1 = arith.constant 0 : i32
    return %c0_i32, %c0_i32_0 : i32, i32
  }
  func.func @transform_2(%arg0: i32) -> (i32, i32) {
    %c0_i32 = arith.constant 0 : i32
    %c0_i32_0 = arith.constant 0 : i32
    %c0_i32_1 = arith.constant 0 : i32
    return %c0_i32, %c0_i32_0 : i32, i32
  }
  func.func @transform_3(%arg0: i32) -> (i32, i32) {
    %c0_i32 = arith.constant 0 : i32
    %c0_i32_0 = arith.constant 0 : i32
    %c0_i32_1 = arith.constant 0 : i32
    return %c0_i32, %c0_i32_0 : i32, i32
  }
  func.func @transform_4(%arg0: i32) -> (i32, i32) {
    %c0_i32 = arith.constant 0 : i32
    %c0_i32_0 = arith.constant 0 : i32
    %c0_i32_1 = arith.constant 0 : i32
    return %c0_i32, %c0_i32_0 : i32, i32
  }
  func.func @transform_5(%arg0: i32) -> (i32, i32) {
    %c0_i32 = arith.constant 0 : i32
    %c0_i32_0 = arith.constant 0 : i32
    %c0_i32_1 = arith.constant 0 : i32
    return %c0_i32, %c0_i32_0 : i32, i32
  }
  func.func @transform_6(%arg0: i32) -> (i32, i32) {
    %c0_i32 = arith.constant 0 : i32
    %c0_i32_0 = arith.constant 0 : i32
    %c0_i32_1 = arith.constant 0 : i32
    return %c0_i32, %c0_i32_0 : i32, i32
  }
  func.func @transform_7(%arg0: i32) -> (i32, i32) {
    %c0_i32 = arith.constant 0 : i32
    %c0_i32_0 = arith.constant 0 : i32
    return %c0_i32, %arg0 : i32, i32
  }
}

</mosaic_0001>

<bundles_post_ra>
// kernel: mlp_forward.1
= control target key start
LH: loop header
LB: loop body
LE: loop exit
PB: predicated region body
PF: predicated region fallthrough
CT: control target
= control target key end

     0   :  { %12 = vsyncpa [#allocation3], 0  ;;  %s1190_s0 = inlined_call_operand.vmem [shape: bf16[4,2048], index: 0, kind: input, shape index: {}]   ;;  %s1191_s1 = inlined_call_operand.vmem [shape: bf16[32,4], index: 1, kind: input, shape index: {}]   ;;  %s1192_s2 = inlined_call_operand.vmem [shape: f32[32,1], index: 2, kind: input, shape index: {}]   ;;  %s1193_s3 = inlined_call_operand.vmem [shape: bf16[32,32], index: 3, kind: input, shape index: {}]   ;;  %s1194_s4 = inlined_call_operand.vmem [shape: f32[32,1], index: 4, kind: input, shape index: {}]   ;;  %s1195_s5 = inlined_call_operand.vmem [shape: bf16[3,32], index: 5, kind: input, shape index: {}]   ;;  %s1196_s6 = inlined_call_operand.vmem [shape: f32[3,1], index: 6, kind: input, shape index: {}]   ;;  %s1197_s7 = inlined_call_operand.hbm [shape: f32[3,2048], index: 7, kind: output, shape index: {}]  }
   0x1   :  { %14 = vsyncpa [#allocation3 + $0x1], 0  ;;  %s1023_s24 = smov 0   ;;  %s1025_s25 = smov 0  }
   0x2   :  { %s1027_s26 = smov 0   ;;  %s1029_s27 = smov 0  }
   0x3 LB: > { %s1044_s28 = sadd.s32 4294967295, %s978_s27   ;;  %s839_s29 = sadd.s32 4294967294, %s978_s27   ;;  %s978_s27 = sphi %s1029_s27, %s1203_s27   ;;  %s974_s26 = sphi %s1027_s26, %s1202_s26   ;;  %s970_s25 = sphi %s1025_s25, %s1201_s25   ;;  %s966_s24 = sphi %s1023_s24, %s1200_s24  }
   0x4   : > { %s1048_s30 = sadd.s32 1, %s978_s27   ;;  %s179_s8 = sadd.s32 1, %s974_s26 }
   0x5   : > { %s176_s9 = ssub.s32 %s978_s27, %s1048_s30  ;;  %p189_p0 = scmp.ne.s32.totalorder %s974_s26, %s970_s25 }
   0x6   : > { %p177_p1 = scmp.eq.s32.totalorder %s176_s9, 0  ;;  %p190_p2 = scmp.eq.s32.totalorder %s1044_s28, 3 }
   0x7   : > { %p195_p3 = scmp.ne.s32.totalorder %s970_s25, %s966_s24  ;;  %p196_p4 = scmp.eq.s32.totalorder %s839_s29, 3 }
   0x8   : > { %s1059_s10 = scalar_select %p177_p1, %s974_s26, %s179_s8  }
   0x9   : > { %p1061_p5 = por %p190_p2, %p189_p0  ;;  %p1065_p6 = por %p196_p4, %p195_p3 }
   0xa   : > { %p842_p7 = scmp.ge.s32.totalorder %s978_s27, 1  ;;  %p241_p8 = scmp.lt.s32.totalorder %s978_s27, 5 }
   0xc   : > { %p242_p9 = pnand %p842_p7, %p241_p8 }
   0xd   : > { %s844_s13 = sshll.u32 (!%p242_p9), %s1044_s28, 2  ;;  %v325_v0 = vlaneseq (!%p242_p9)  ;;  %v980_v1 = vmov (!%p242_p9), 1983009808   ;;  %v981_v3 = vmov (!%p242_p9), 0   ;;  %v286_v6 = vld [vmem:[%s1192_s2] sm:$0xff] (!%p242_p9)  ;;  %v288_v7 = vld [vmem:[%s1192_s2 + $0x10] sm:$0xff] (!%p242_p9) }
   0xe   : > { %245 = sbr.rel (%p242_p9) target bundleno = 732 (0x2dc), region = 48  ;;  %p274_p10 = scmp.lt.s32.totalorder (!%p242_p9), %s844_s13, 15  ;;  %v323_v2 = vunpack.c.l.s4 (!%p242_p9), %v980_v1  ;;  %390 = vmatprep.mubr.bf16.mxu0 (!%p242_p9), %v981_v3  ;;  %443 = vmatprep.mubr.bf16.mxu1 (!%p242_p9), %v981_v3  ;;  %v287_v9 = vld [vmem:[%s1192_s2 + $0x8] sm:$0xff] (!%p242_p9)  ;;  %v289_v10 = vld [vmem:[%s1192_s2 + $0x18] sm:$0xff] (!%p242_p9)  ;;  %vm345_vm0 = vcmask (!%p242_p9), 1041408   ;;  %v492_v14 = vld [vmem:[%s1194_s4] sm:$0xff] (!%p242_p9) }
   0xf   : > { %v326_v4 = vshrl.u32 (!%p242_p9), %v325_v0, 7  ;;  %909 = vset.pattern.permute.xlu0 (!%p242_p9), %v981_v3  ;;  %910 = vset.pattern.permute.xlu1 (!%p242_p9), %v981_v3  ;;  %v493_v18 = vld [vmem:[%s1194_s4 + $0x8] sm:$0xff] (!%p242_p9)  ;;  %v912_v21 = vld [vmem:[%s1191_s1] sm:$0xff] (!%p242_p9)   ;;  %vm338_vm1 = vcmask (!%p242_p9), 31744   ;;  %v494_v22 = vld [vmem:[%s1194_s4 + $0x10] sm:$0xff] (!%p242_p9)  ;;  %vm526_vm2 = vcmask (!%p242_p9), 261120  }
  0x10   : > { %v324_v5 = vunpack.c.0.s8 (!%p242_p9), %v323_v2  ;;  %292 = vperm.xlu0 (!%p242_p9), %909, %v286_v6   ;;  %302 = vperm.xlu1 (!%p242_p9), %910, %v288_v7   ;;  %v495_v23 = vld [vmem:[%s1194_s4 + $0x18] sm:$0xff] (!%p242_p9)  ;;  %v664_v24 = vld [vmem:[%s1196_s6] sm:$0x7] (!%p242_p9)  ;;  %v913_v25 = vld [vmem:[%s1191_s1 + $0x8] sm:$0xff] (!%p242_p9)   ;;  %s867_s20 = sshll.u32 (!%p242_p9), %s1044_s28, 8 }
  0x12   : > { %v327_v8 = vsub.s32 (!%p242_p9), %v324_v5, %v326_v4 }
  0x14   : > { %297 = vperm.xlu0 (!%p242_p9), %909, %v287_v9   ;;  %307 = vperm.xlu1 (!%p242_p9), %910, %v289_v10  }
  0x15   : > { %s1205_s13 = smov (!%p274_p10, %s844_s13), 15 }
  0x16   : > { %s845_s18 = sshll.u32 %s1205_s13, 1  ;;  %s982_s13 = smov [#allocation2]  }
  0x17   : > { %s277_s8 = scalar_lea.vmem %s1190_s0, %s845_s18  ;;  %s270_s18 = sand.u32 1, %s970_s25  }
  0x18   : > { %v281_v11 = vld [vmem:[%s277_s8] sm:$0xff]  ;;  %498 = vperm.xlu0 %909, %v492_v14   ;;  %503 = vperm.xlu1 %910, %v493_v18   ;;  %s843_s19 = sshll.u32 %s270_s18, 4  ;;  %s1148_s8 = scalar_lea.hbm %s1197_s7, %s867_s20 }
  0x19   : > { %v328_v12 = vrot.slane %v281_v11, %v327_v8  ;;  %v321_v13 = vcombine.high %v281_v11, %v281_v11  ;;  %s272_s21 = scalar_lea.vmem [#allocation2], %s843_s19  ;;  %s766_s28 = scalar_lea.sflag [#allocation3], %s270_s18 }
  0x1a   : > { %s780_s22 = sshll.u32 %s272_s21, 4  ;;  %s920_s14 = sshll.u32 %s982_s13, 4  ;;  %s1150_s22 = int_to_ptr.vmem [resolvable:$true] %s780_s22  ;;  %s921_s14 = int_to_ptr.vmem [resolvable:$false] %s920_s14 }
  0x1b   : > { %v336_v15 = vcombine.high %v328_v12, %v328_v12  ;;  %v347_v16 = vsel %vm345_vm0, %v328_v12, 0  ;;  %v335_v17 = vrot.slane %v321_v13, %v327_v8  ;;  %s916_s9 = scalar_lea.vmem %s1150_s22, 256  ;;  %s922_s15 = scalar_lea.vmem %s921_s14, 512 }
  0x1c   : > { %508 = vperm.xlu0 %909, %v494_v22   ;;  %513 = vperm.xlu1 %910, %v495_v23   ;;  %v914_v23 = vld [vmem:[%s1193_s3] sm:$0xff]   ;;  %p917_p11 = scmp.ne.s32.totalorder %s1150_s22, %s916_s9  ;;  %p923_p0 = scmp.lt.s32.totalorder %s1150_s22, %s921_s14 }
  0x1d   : > { %848 = vmatprep.subr.msk.bf16.mxu0 %vm345_vm0, %v336_v15  ;;  %v337_v19 = vcombine.high %v335_v17, %v335_v17  ;;  %v353_v20 = vsel %vm345_vm0, %v335_v17, 0  ;;  %p924_p1 = scmp.lt.s32.totalorder %s922_s15, %s916_s9 }
  0x1e   : > { %359 = vmatpush1.bf16.msra.mxu0 %v347_v16  ;;  %p918_p12 = pnand %p917_p11, %p1061_p5 }
  0x1f   : > { %851 = vmatprep.subr.msk.bf16.mxu1 %vm345_vm0, %v337_v19  ;;  %p925_p2 = por %p924_p1, %p923_p0 }
  0x20   : > { %412 = vmatpush1.bf16.msra.mxu1 %v353_v20  ;;  %667 = vperm.xlu0 %909, %v664_v24   ;;  %v915_v24 = vld [vmem:[%s1193_s3 + $0x8] sm:$0xff]   ;;  %p919_p13 = pneg %p918_p12 }
  0x21   : > { %849 = vmatmul.mubr.msk.bf16.vlgmr.msra.gmra.mrb[0].mxu0 %vm338_vm1, %v912_v21 }
  0x22   : > { %400 = vmatprep.mubr.bf16.mxu0 %v981_v3  ;;  %p926_p3 = pnand %p925_p2, %p919_p13 }
  0x23   : > { %852 = vmatmul.mubr.msk.bf16.vlgmr.msra.gmra.mrb[0].mxu1 %vm338_vm1, %v912_v21 }
  0x24   : > { %453 = vmatprep.mubr.bf16.mxu1 %v981_v3 }
  0x29   : > { %850 = vmatmul.mubr.msk.bf16.gmra.mrb[4].mxu0 %vm338_vm1, %v913_v25 }
  0x2a   : > { %565 = vmatprep.mubr.bf16.mxu0 %v981_v3 }
  0x2b   : > { %853 = vmatmul.mubr.msk.bf16.gmra.mrb[4].mxu1 %vm338_vm1, %v913_v25 }
  0x2c   : > { %618 = vmatprep.mubr.bf16.mxu1 %v981_v3 }
  0x8f   : > { %v293_v26 = vpop.permute.xlu0 %292  ;;  %v303_v27 = vpop.permute.xlu1 %302 }
  0x93   : > { %v298_v29 = vpop.permute.xlu0 %297  ;;  %v308_v56 = vpop.permute.xlu1 %307 }
  0x97   : > { %v499_v25 = vpop.permute.xlu0 %498 }
  0xf4   : > { %v392_v28 = vpop.f32.mrb[0].mxu0 }
  0xf5   : > { %v393_v30 = vadd.f32 %v392_v28, %v293_v26  ;;  %v394_v31 = vpop.f32.mrb[1].mxu0 }
  0xf6   : > { %v395_v32 = vadd.f32 %v394_v31, %v293_v26  ;;  %v396_v33 = vpop.f32.mrb[2].mxu0  ;;  %v445_v34 = vpop.f32.mrb[0].mxu1 }
  0xf7   : > { %v464_v35 = vmax.f32 %v393_v30, 0.0  ;;  %v397_v36 = vadd.f32 %v396_v33, %v298_v29  ;;  %v446_v37 = vadd.f32 %v445_v34, %v293_v26  ;;  %v398_v38 = vpop.f32.mrb[3].mxu0  ;;  %v447_v39 = vpop.f32.mrb[1].mxu1 }
  0xf8   : > { %v465_v40 = vmax.f32 %v395_v32, 0.0  ;;  %v399_v41 = vadd.f32 %v398_v38, %v298_v29  ;;  %v448_v42 = vadd.f32 %v447_v39, %v293_v26  ;;  %v449_v43 = vpop.f32.mrb[2].mxu1 }
  0xf9   : > { %v468_v44 = vmax.f32 %v397_v36, 0.0  ;;  %v450_v45 = vadd.f32 %v449_v43, %v298_v29  ;;  %v451_v46 = vpop.f32.mrb[3].mxu1  ;;  %v466_v50 = vmax.f32 %v446_v37, 0.0 }
  0xfa   : > { %v469_v47 = vmax.f32 %v399_v41, 0.0  ;;  %v452_v48 = vadd.f32 %v451_v46, %v298_v29  ;;  %v467_v53 = vmax.f32 %v448_v42, 0.0 }
  0xfb   : > { %v480_v49 = vpack.c.bf16 %v468_v44, %v464_v35  ;;  %v470_v51 = vmax.f32 %v450_v45, 0.0 }
  0xfc   : > { %v481_v52 = vpack.c.bf16 %v469_v47, %v465_v40  ;;  %v471_v54 = vmax.f32 %v452_v48, 0.0  ;;  %v402_v55 = vpop.f32.mrb[4].mxu0 }
  0xfd   : > { %v482_v57 = vpack.c.bf16 %v470_v51, %v466_v50  ;;  %v403_v58 = vadd.f32 %v402_v55, %v303_v27  ;;  %v404_v59 = vpop.f32.mrb[5].mxu0 }
  0xfe   : > { %v483_v60 = vpack.c.bf16 %v471_v54, %v467_v53  ;;  %v405_v61 = vadd.f32 %v404_v59, %v303_v27  ;;  %v406_v62 = vpop.f32.mrb[6].mxu0  ;;  %v455_v63 = vpop.f32.mrb[4].mxu1  ;;  %533 = vmatprep.subr.bf16.mxu0 %v481_v52 }
  0xff   : > { %v472_v0 = vmax.f32 %v403_v58, 0.0  ;;  %v407_v1 = vadd.f32 %v406_v62, %v308_v56  ;;  %v456_v2 = vadd.f32 %v455_v63, %v303_v27  ;;  %v408_v4 = vpop.f32.mrb[7].mxu0  ;;  %v457_v5 = vpop.f32.mrb[5].mxu1  ;;  %534 = vmatpush1.bf16.msra.mxu0 %v480_v49 }
 0x100   : > { %v409_v6 = vadd.f32 %v408_v4, %v308_v56  ;;  %v458_v7 = vadd.f32 %v457_v5, %v303_v27  ;;  %v459_v8 = vpop.f32.mrb[6].mxu1  ;;  %586 = vmatprep.subr.bf16.mxu1 %v483_v60  ;;  %v473_v12 = vmax.f32 %v405_v61, 0.0  ;;  %v504_v27 = vpop.permute.xlu1 %503 }
 0x101   : > { %v476_v9 = vmax.f32 %v407_v1, 0.0  ;;  %v460_v10 = vadd.f32 %v459_v8, %v308_v56  ;;  %v461_v11 = vpop.f32.mrb[7].mxu1  ;;  %587 = vmatpush1.bf16.msra.mxu1 %v482_v57  ;;  %v474_v16 = vmax.f32 %v456_v2, 0.0  ;;  %v509_v49 = vpop.permute.xlu0 %508 }
 0x102   : > { %v477_v13 = vmax.f32 %v409_v6, 0.0  ;;  %v462_v14 = vadd.f32 %v461_v11, %v308_v56  ;;  %v475_v19 = vmax.f32 %v458_v7, 0.0 }
 0x103   : > { %v484_v15 = vpack.c.bf16 %v476_v9, %v472_v0  ;;  %v478_v17 = vmax.f32 %v460_v10, 0.0 }
 0x104   : > { %v485_v18 = vpack.c.bf16 %v477_v13, %v473_v12  ;;  %v479_v20 = vmax.f32 %v462_v14, 0.0  ;;  %v514_v54 = vpop.permute.xlu1 %513 }
 0x105   : > { %v486_v21 = vpack.c.bf16 %v478_v17, %v474_v16 }
 0x106   : > { %v487_v22 = vpack.c.bf16 %v479_v20, %v475_v19  ;;  %535 = vmatprep.subr.bf16.mxu0 %v485_v18 }
 0x107   : > { %536 = vmatpush1.bf16.msra.mxu0 %v484_v15 }
 0x108   : > { %588 = vmatprep.subr.bf16.mxu1 %v487_v22  ;;  %v668_v22 = vpop.permute.xlu0 %667 }
 0x109   : > { %589 = vmatpush1.bf16.msra.mxu1 %v486_v21  ;;  %v663_v21 = vld [vmem:[%s1195_s5] sm:$0x3] }
 0x10a   : > { %856 = vmatmul.mubr.msk.bf16.vlgmr.msra.gmra.mrb[8].mxu0 %vm526_vm2, %v914_v23 }
 0x10b   : > { %575 = vmatprep.mubr.bf16.mxu0 %v981_v3 }
 0x10c   : > { %858 = vmatmul.mubr.msk.bf16.vlgmr.msra.gmra.mrb[8].mxu1 %vm526_vm2, %v914_v23 }
 0x10d   : > { %628 = vmatprep.mubr.bf16.mxu1 %v981_v3 }
 0x112   : > { %857 = vmatmul.mubr.msk.bf16.gmra.mrb[12].mxu0 %vm526_vm2, %v915_v24 }
 0x113   : > { %705 = vmatprep.mubr.bf16.mxu0 %v981_v3 }
 0x114   : > { %859 = vmatmul.mubr.msk.bf16.gmra.mrb[12].mxu1 %vm526_vm2, %v915_v24 }
 0x115   : > { %746 = vmatprep.mubr.bf16.mxu1 %v981_v3 }
 0x1dd   : > { %v567_v26 = vpop.f32.mrb[8].mxu0 }
 0x1de   : > { %v568_v28 = vadd.f32 %v567_v26, %v499_v25  ;;  %v569_v29 = vpop.f32.mrb[9].mxu0 }
 0x1df   : > { %v570_v30 = vadd.f32 %v569_v29, %v499_v25  ;;  %v571_v31 = vpop.f32.mrb[10].mxu0  ;;  %v620_v32 = vpop.f32.mrb[8].mxu1 }
 0x1e0   : > { %v572_v33 = vadd.f32 %v571_v31, %v504_v27  ;;  %v621_v34 = vadd.f32 %v620_v32, %v499_v25  ;;  %v573_v35 = vpop.f32.mrb[11].mxu0  ;;  %v622_v36 = vpop.f32.mrb[9].mxu1  ;;  %v639_v40 = vmax.f32 %v568_v28, 0.0 }
 0x1e1   : > { %v574_v37 = vadd.f32 %v573_v35, %v504_v27  ;;  %v623_v38 = vadd.f32 %v622_v36, %v499_v25  ;;  %v624_v39 = vpop.f32.mrb[10].mxu1  ;;  %v640_v3 = vmax.f32 %v570_v30, 0.0 }
 0x1e2   : > { %v643_v41 = vmax.f32 %v572_v33, 0.0  ;;  %v625_v42 = vadd.f32 %v624_v39, %v504_v27  ;;  %v626_v43 = vpop.f32.mrb[11].mxu1  ;;  %v641_v47 = vmax.f32 %v621_v34, 0.0 }
 0x1e3   : > { %v644_v44 = vmax.f32 %v574_v37, 0.0  ;;  %v627_v45 = vadd.f32 %v626_v43, %v504_v27  ;;  %v642_v51 = vmax.f32 %v623_v38, 0.0 }
 0x1e4   : > { %v655_v46 = vpack.c.bf16 %v643_v41, %v639_v40  ;;  %v645_v48 = vmax.f32 %v625_v42, 0.0 }
 0x1e5   : > { %v656_v50 = vpack.c.bf16 %v644_v44, %v640_v3  ;;  %v646_v52 = vmax.f32 %v627_v45, 0.0  ;;  %v577_v53 = vpop.f32.mrb[12].mxu0 }
 0x1e6   : > { %v657_v55 = vpack.c.bf16 %v645_v48, %v641_v47  ;;  %v578_v56 = vadd.f32 %v577_v53, %v509_v49  ;;  %v579_v57 = vpop.f32.mrb[13].mxu0 }
 0x1e7   : > { %v658_v58 = vpack.c.bf16 %v646_v52, %v642_v51  ;;  %v580_v59 = vadd.f32 %v579_v57, %v509_v49  ;;  %v581_v60 = vpop.f32.mrb[14].mxu0  ;;  %v630_v61 = vpop.f32.mrb[12].mxu1  ;;  %673 = vmatprep.subr.bf16.mxu0 %v656_v50 }
 0x1e8   : > { %v582_v62 = vadd.f32 %v581_v60, %v514_v54  ;;  %v631_v63 = vadd.f32 %v630_v61, %v509_v49  ;;  %v583_v0 = vpop.f32.mrb[15].mxu0  ;;  %v632_v1 = vpop.f32.mrb[13].mxu1  ;;  %674 = vmatpush1.bf16.msra.mxu0 %v655_v46  ;;  %v647_v6 = vmax.f32 %v578_v56, 0.0 }
 0x1e9   : > { %v584_v2 = vadd.f32 %v583_v0, %v514_v54  ;;  %v633_v4 = vadd.f32 %v632_v1, %v509_v49  ;;  %v634_v5 = vpop.f32.mrb[14].mxu1  ;;  %714 = vmatprep.subr.bf16.mxu1 %v658_v58  ;;  %v648_v10 = vmax.f32 %v580_v59, 0.0 }
 0x1ea   : > { %v651_v7 = vmax.f32 %v582_v62, 0.0  ;;  %v635_v8 = vadd.f32 %v634_v5, %v514_v54  ;;  %v636_v9 = vpop.f32.mrb[15].mxu1  ;;  %715 = vmatpush1.bf16.msra.mxu1 %v657_v55  ;;  %v649_v14 = vmax.f32 %v631_v63, 0.0 }
 0x1eb   : > { %v652_v11 = vmax.f32 %v584_v2, 0.0  ;;  %v637_v12 = vadd.f32 %v636_v9, %v514_v54  ;;  %v650_v17 = vmax.f32 %v633_v4, 0.0 }
 0x1ec   : > { %v659_v13 = vpack.c.bf16 %v651_v7, %v647_v6  ;;  %v653_v15 = vmax.f32 %v635_v8, 0.0 }
 0x1ed   : > { %v660_v16 = vpack.c.bf16 %v652_v11, %v648_v10  ;;  %v654_v18 = vmax.f32 %v637_v12, 0.0 }
 0x1ee   : > { %v661_v19 = vpack.c.bf16 %v653_v15, %v649_v14 }
 0x1ef   : > { %v662_v20 = vpack.c.bf16 %v654_v18, %v650_v17  ;;  %675 = vmatprep.subr.bf16.mxu0 %v660_v16 }
 0x1f0   : > { %676 = vmatpush1.bf16.msra.mxu0 %v659_v13 }
 0x1f1   : > { %716 = vmatprep.subr.bf16.mxu1 %v662_v20 }
 0x1f2   : > { %717 = vmatpush1.bf16.msra.mxu1 %v661_v19 }
 0x1f3   : > { %860 = vmatmul.mubr.msk.bf16.vlgmr.msra.gmra.mrb[16].mxu0 %vm526_vm2, %v663_v21 }
 0x1f5   : > { %861 = vmatmul.mubr.msk.bf16.vlgmr.msra.gmra.mrb[16].mxu1 %vm526_vm2, %v663_v21 }
 0x2c6   : > { %v707_v23 = vpop.f32.mrb[16].mxu0 }
 0x2c7   : > { %v708_v24 = vadd.f32 %v707_v23, %v668_v22  ;;  %v709_v25 = vpop.f32.mrb[17].mxu0 }
 0x2c8   : > { %v710_v26 = vadd.f32 %v709_v25, %v668_v22  ;;  %v748_v27 = vpop.f32.mrb[16].mxu1  ;;  %v711_v28 = vpop.f32.mrb[18].mxu0 }
 0x2c9   : > { %v749_v29 = vadd.f32 %v748_v27, %v668_v22  ;;  %v750_v30 = vpop.f32.mrb[17].mxu1  ;;  %v712_v31 = vpop.f32.mrb[19].mxu0 }
 0x2ca   : > { %v759_v32 = vcombine.low %v708_v24, %v710_v26  ;;  %v751_v33 = vadd.f32 %v750_v30, %v668_v22  ;;  %v752_v34 = vpop.f32.mrb[18].mxu1 }
 0x2cb   : > { %v753_v35 = vpop.f32.mrb[19].mxu1 }
 0x2cc   : > { %763 = vst [vmem:[%s272_s21] sm:$0x77] %v759_v32  ;;  %v760_v36 = vcombine.low %v749_v29, %v751_v33 }
 0x2ce   : > { %764 = vst [vmem:[%s272_s21 + $0x8] sm:$0x77] %v760_v36 }
 0x2cf   : > { %929 = shalt.err (!%p926_p3)
}
 0x2d0   : > { %s930_s16 = scalar_lea.hbm %s1148_s8, 256  ;;  %s934_s19 = scalar_lea.hbm %s1197_s7, 1024 }
 0x2d1   : > { %p931_p4 = scmp.ne.s32.totalorder %s1148_s8, %s930_s16  ;;  %p935_p9 = scmp.lt.u32.totalorder %s1148_s8, %s1197_s7 }
 0x2d2   : > { %p936_p10 = scmp.lt.u32.totalorder %s934_s19, %s930_s16  ;;  %p938_p12 = scmp.lt.u32.totalorder %s930_s16, %s1148_s8 }
 0x2d3   : > { %p932_p7 = pnand %p931_p4, %p1061_p5 }
 0x2d4   : > { %p937_p11 = por %p936_p10, %p935_p9 }
 0x2d5   : > { %p933_p8 = pneg %p932_p7 }
 0x2d6   : > { %p939_p13 = por %p938_p12, %p937_p11 }
 0x2d8   : > { %p940_p0 = pnand %p939_p13, %p933_p8 }
 0x2da   : > { %943 = shalt.err (!%p940_p0)
}
 0x2db   : > { %868 = dma.vmem_to_hbm [thread:$0]  (%p1061_p5), %s1150_s22, 256, %s1148_s8, %s766_s28  }
 0x2dc PF: > { %p874_p1 = scmp.ge.s32.totalorder %s978_s27, 2  ;;  %s792_s23 = sand.u32 1, %s966_s24  }
 0x2dd   : > { %s793_s29 = scalar_lea.sflag [#allocation3], %s792_s23 }
 0x2de   : > { %p871_p2 = pnand %p874_p1, %p1065_p6 }
 0x2e0   : > { %961 = dma.done.wait (!%p871_p2), %s793_s29, 256  }
 0x2e1   : > { %963 = vsyncadd (!%p871_p2), %s793_s29, 4294967040  ;;  %p17_p3 = scmp.ge.s32.totalorder %s1048_s30, 6   ;;  %s1200_s24 = smov %s970_s25 }
 0x2e2   : > { %s1201_s25 = smov %s974_s26  ;;  %s1202_s26 = smov %s1059_s10 }
 0x2e3   : > { %s1203_s27 = smov %s1048_s30  ;;  %19 = sbr.rel (!%p17_p3) target bundleno = 3 (0x3), region = 83 }
 0x2ea   :  { %798 = vsyncpa [#allocation3], 1 }
 0x2eb   :  { %800 = vsyncpa [#allocation3 + $0x1], 1 }

</bundles_post_ra>
